<compile_context>
chip_gen: v7x
topology: tpu7x:2x2x1
jax: 0.10.0
libtpu: 0.0.40
codegen_flags: <defaults>
</compile_context>

<pallas_src>
import math
import functools

import jax
import jax.numpy as jnp
from jax.experimental import pallas as pl
from jax.experimental.pallas import tpu as pltpu


# ----------------------------------------------------------------------------
# Helpers
# ----------------------------------------------------------------------------
def _pick_tile(dim, target):
    """Largest power-of-two tile <= target that divides dim (falls back to full dim)."""
    if dim <= target:
        return dim
    t = target
    while t >= 8:
        if dim % t == 0:
            return t
        t //= 2
    return dim


# ----------------------------------------------------------------------------
# Kernel 1: tiled dense projection  y = x @ W^T + b   (W in PyTorch (d_out, d_in))
# ----------------------------------------------------------------------------
def linear_kernel(x_ref, w_ref, b_ref, o_ref, acc_ref):
    @pl.when(pl.program_id(2) == 0)
    def _():
        acc_ref[...] = jnp.zeros_like(acc_ref)

    # Contract last dim of x (tm, tk) with last dim of w (tn, tk): feeds the MXU
    # directly, no transpose materialized.
    acc_ref[...] += jax.lax.dot_general(
        x_ref[...], w_ref[...],
        dimension_numbers=(((1,), (1,)), ((), ())),
        preferred_element_type=jnp.float32,
    )

    @pl.when(pl.program_id(2) == pl.num_programs(2) - 1)
    def _():
        o_ref[...] = (acc_ref[...] + b_ref[...]).astype(o_ref.dtype)


def linear(x, w, b, *, out_dtype=None, tm=512, tn=512, tk=None):
    """x: (M, d_in), w: (d_out, d_in), b: (d_out,) -> (M, d_out) in out_dtype.

    out_dtype defaults to x.dtype so a bf16 activation chain stays bf16 end-to-end
    (no extra HBM round trip for re-casting); accumulation is always f32.
    """
    M, K = x.shape
    N = w.shape[0]
    tm = _pick_tile(M, tm)
    tn = _pick_tile(N, tn)
    tk = K if tk is None else _pick_tile(K, tk)
    out_dtype = x.dtype if out_dtype is None else out_dtype

    b2 = b.reshape(1, N).astype(jnp.float32)

    # Explicit VMEM budget from the chosen block set (double-buffered inputs/outputs
    # + resident f32 accumulator), floored/capped so pipeline depth is predictable.
    xi = x.dtype.itemsize
    wi = w.dtype.itemsize
    oi = jnp.dtype(out_dtype).itemsize
    needed = 2 * (tm * tk * xi + tn * tk * wi + tn * 4) + 2 * tm * tn * oi + tm * tn * 4
    vmem_limit = int(min(64 << 20, max(needed + (4 << 20), 16 << 20)))

    grid = (M // tm, N // tn, K // tk)
    return pl.pallas_call(
        linear_kernel,
        out_shape=jax.ShapeDtypeStruct((M, N), out_dtype),
        grid_spec=pltpu.PrefetchScalarGridSpec(
            num_scalar_prefetch=0,
            grid=grid,
            in_specs=[
                pl.BlockSpec((tm, tk), lambda i, j, k: (i, k)),
                pl.BlockSpec((tn, tk), lambda i, j, k: (j, k)),
                pl.BlockSpec((1, tn), lambda i, j, k: (0, j)),
            ],
            out_specs=pl.BlockSpec((tm, tn), lambda i, j, k: (i, j)),
            scratch_shapes=[pltpu.VMEM((tm, tn), jnp.float32)],
        ),
        compiler_params=pltpu.CompilerParams(
            dimension_semantics=("parallel", "parallel", "arbitrary"),
            vmem_limit_bytes=vmem_limit,
        ),
    )(x, w, b2)


# ----------------------------------------------------------------------------
# Kernel 2: attention, query-tiled grid (B, Sq//tq), per-head lane-slice stores
# ----------------------------------------------------------------------------
def attention_kernel(*refs, h, d_k, has_bias):
    if has_bias:
        q_ref, k_ref, v_ref, bias_ref, o_ref = refs
    else:
        q_ref, k_ref, v_ref, o_ref = refs
        bias_ref = None

    # 1/sqrt(d_k) is already folded into W_q / b_q, so scores need no scaling here.
    q = q_ref[0]                 # (tq, d_model)
    k = k_ref[0]                 # (Sk, d_model)
    v = v_ref[0]                 # (Sk, d_model)
    bias = bias_ref[0] if has_bias else None   # (tq, Sk) additive f32 bias

    for hd in range(h):          # static unroll; heads are static lane slices
        sl = slice(hd * d_k, (hd + 1) * d_k)
        qh = q[:, sl]
        kh = k[:, sl]
        vh = v[:, sl]

        # scores = q_h @ k_h^T (contract d_k of both operands, no transpose)
        s = jax.lax.dot_general(
            qh, kh,
            dimension_numbers=(((1,), (1,)), ((), ())),
            preferred_element_type=jnp.float32,
        )
        if has_bias:
            s = s + bias
        # NOTE: for rows that are fully masked this yields a (shifted-)softmax of the
        # raw scores rather than the reference's uniform distribution; identical to
        # the reference whenever every row has at least one visible key (causal masks).
        m_row = jnp.max(s, axis=-1, keepdims=True)
        e = jnp.exp(s - m_row)
        denom = jnp.sum(e, axis=-1, keepdims=True)

        # Normalize AFTER the PV matmul: h*tq*d_k VPU muls instead of h*tq*Sk.
        pv = jnp.dot(e.astype(vh.dtype), vh, preferred_element_type=jnp.float32)
        inv = pl.reciprocal(denom, approx=True)   # EUP slot; inference-grade accuracy
        o_ref[0, :, sl] = (pv * inv).astype(o_ref.dtype)


def mha_attention(q_arr, k_arr, v_arr, bias, bias_shared, h, d_model, *,
                  q_blk=0, k_blk=0, v_blk=0, tq_target=256):
    """q_arr: (B, Sq, nq*d_model), k_arr/v_arr: (B, Sk, nk*d_model).

    q_blk/k_blk/v_blk select which d_model-wide block of the last dim holds the
    projection (lets fused QKV / KV matmul outputs be consumed without slicing).
    bias: None or (1 or B, Sq, Sk) additive f32 bias; bias_shared => leading dim 1.
    """
    B, Sq, _ = q_arr.shape
    Sk = k_arr.shape[1]
    d_k = d_model // h
    tq = _pick_tile(Sq, tq_target)
    grid = (B, Sq // tq)
    out_dtype = q_arr.dtype

    q_spec = pl.BlockSpec((1, tq, d_model), lambda b, qi, o=q_blk: (b, qi, o))
    k_spec = pl.BlockSpec((1, Sk, d_model), lambda b, qi, o=k_blk: (b, 0, o))
    v_spec = pl.BlockSpec((1, Sk, d_model), lambda b, qi, o=v_blk: (b, 0, o))
    out_spec = pl.BlockSpec((1, tq, d_model), lambda b, qi: (b, qi, 0))

    in_specs = [q_spec, k_spec, v_spec]
    args = [q_arr, k_arr, v_arr]
    if bias is not None:
        if bias_shared:
            in_specs.append(pl.BlockSpec((1, tq, Sk), lambda b, qi: (0, qi, 0)))
        else:
            in_specs.append(pl.BlockSpec((1, tq, Sk), lambda b, qi: (b, qi, 0)))
        args.append(bias)

    kern = functools.partial(attention_kernel, h=h, d_k=d_k,
                             has_bias=bias is not None)

    # Explicit VMEM budget: double-buffered q/k/v/out blocks + bias + score scratch.
    itm = q_arr.dtype.itemsize
    kv_bytes = 2 * 2 * Sk * d_model * itm
    qo_bytes = 2 * 2 * tq * d_model * itm
    bias_bytes = 0 if bias is None else 2 * tq * Sk * bias.dtype.itemsize
    scratch_bytes = 4 * tq * Sk * 4 + 4 * tq * d_model * 4
    vmem_limit = int(min(64 << 20,
                         max(kv_bytes + qo_bytes + bias_bytes + scratch_bytes + (4 << 20),
                             16 << 20)))

    return pl.pallas_call(
        kern,
        out_shape=jax.ShapeDtypeStruct((B, Sq, d_model), out_dtype),
        grid_spec=pltpu.PrefetchScalarGridSpec(
            num_scalar_prefetch=0,
            grid=grid,
            in_specs=in_specs,
            out_specs=out_spec,
        ),
        compiler_params=pltpu.CompilerParams(
            dimension_semantics=("parallel", "parallel"),
            vmem_limit_bytes=vmem_limit,
        ),
    )(*args)


# ----------------------------------------------------------------------------
# Parameter prep (one-time): fused weights, folded 1/sqrt(d_k), compute dtype casts
# ----------------------------------------------------------------------------
def prepare_params(params, h, *, compute_dtype=None):
    d_model = params["w_q"].shape[0]
    d_k = d_model // h
    scale = jnp.float32(1.0 / math.sqrt(d_k))
    cdt = jnp.float32 if compute_dtype is None else compute_dtype

    w_q_s = params["w_q"] * scale
    b_q_s = params["b_q"] * scale
    return {
        "h": h,
        "d_model": d_model,
        "compute_dtype": cdt,
        # fused Q|K|V (self-attention) and K|V (encoder-decoder cross-attention)
        "w_qkv": jnp.concatenate([w_q_s, params["w_k"], params["w_v"]], 0).astype(cdt),
        "b_qkv": jnp.concatenate([b_q_s, params["b_k"], params["b_v"]], 0).astype(jnp.float32),
        "w_kv": jnp.concatenate([params["w_k"], params["w_v"]], 0).astype(cdt),
        "b_kv": jnp.concatenate([params["b_k"], params["b_v"]], 0).astype(jnp.float32),
        # individual projections (fully-distinct q/k/v sources)
        "w_q": w_q_s.astype(cdt), "b_q": b_q_s.astype(jnp.float32),
        "w_k": params["w_k"].astype(cdt), "b_k": params["b_k"].astype(jnp.float32),
        "w_v": params["w_v"].astype(cdt), "b_v": params["b_v"].astype(jnp.float32),
        "w_o": params["w_o"].astype(cdt), "b_o": params["b_o"].astype(jnp.float32),
    }


def _mask_to_bias(mask, Sq, Sk):
    """PyTorch-style mask (mask==0 -> blocked) -> additive f32 bias, or None.

    Returns (bias, shared): bias has shape (1 or B, Sq, Sk); shared=True when the
    mask is batch-broadcast (leading dim 1) so it is DMA'd once, never B-folded.
    """
    if mask is None:
        return None, True
    m = jnp.asarray(mask)
    if m.ndim == 4:      # (Bm, 1, Sq, Sk)
        m = m[:, 0]
    elif m.ndim == 2:    # (Sq, Sk)
        m = m[None]
    bias = jnp.where(m == 0, jnp.float32(-1.0e9), jnp.float32(0.0))
    return bias, bias.shape[0] == 1


# ----------------------------------------------------------------------------
# Full module forward
# ----------------------------------------------------------------------------
def multi_head_attention_forward(prep, q, k, v, mask):
    """q: (B, Sq, d_model), k/v: (B, Sk, d_model), mask broadcastable (B,1,Sq,Sk)."""
    h = prep["h"]
    cdt = prep["compute_dtype"]
    d_model = prep["d_model"]
    B, Sq, _ = q.shape
    Sk = k.shape[1]
    aligned = (d_model % 128) == 0   # fused outputs consumable via lane-block offsets

    def flat(x, S):
        return x.reshape(B * S, d_model).astype(cdt)

    if (q is k) and (k is v):
        # Self-attention: one fused QKV matmul; scale already folded into w_q block.
        qkv = linear(flat(q, Sq), prep["w_qkv"], prep["b_qkv"]).reshape(B, Sq, 3 * d_model)
        if aligned:
            q_a = k_a = v_a = qkv
            q_b, k_b, v_b = 0, 1, 2
        else:
            q_a = qkv[..., :d_model]
            k_a = qkv[..., d_model:2 * d_model]
            v_a = qkv[..., 2 * d_model:]
            q_b = k_b = v_b = 0
    elif k is v:
        # Encoder-decoder cross-attention: fuse the K and V projections.
        q_a = linear(flat(q, Sq), prep["w_q"], prep["b_q"]).reshape(B, Sq, d_model)
        kv = linear(flat(k, Sk), prep["w_kv"], prep["b_kv"]).reshape(B, Sk, 2 * d_model)
        q_b = 0
        if aligned:
            k_a = v_a = kv
            k_b, v_b = 0, 1
        else:
            k_a = kv[..., :d_model]
            v_a = kv[..., d_model:]
            k_b = v_b = 0
    else:
        q_a = linear(flat(q, Sq), prep["w_q"], prep["b_q"]).reshape(B, Sq, d_model)
        k_a = linear(flat(k, Sk), prep["w_k"], prep["b_k"]).reshape(B, Sk, d_model)
        v_a = linear(flat(v, Sk), prep["w_v"], prep["b_v"]).reshape(B, Sk, d_model)
        q_b = k_b = v_b = 0

    bias, shared = _mask_to_bias(mask, Sq, Sk)

    # Attention consumes / produces (B, S, d_model) directly: no head transposes.
    x = mha_attention(q_a, k_a, v_a, bias, shared, h, d_model,
                      q_blk=q_b, k_blk=k_b, v_blk=v_b)

    out = linear(x.reshape(B * Sq, d_model), prep["w_o"], prep["b_o"],
                 out_dtype=jnp.float32)
    return out.reshape(B, Sq, d_model)


# Pure-JAX reference (mirrors the PyTorch module) for sanity checking.
def reference_forward(params, q, k, v, mask, h):
    B, Sq, d_model = q.shape
    Sk = k.shape[1]
    d_k = d_model // h

    def proj(x, w, b, S):
        return (x @ w.T + b).reshape(B, S, h, d_k).transpose(0, 2, 1, 3)

    query = proj(q, params["w_q"], params["b_q"], Sq)
    key = proj(k, params["w_k"], params["b_k"], Sk)
    value = proj(v, params["w_v"], params["b_v"], Sk)

    s = jnp.einsum("bhqd,bhkd->bhqk", query, key) / math.sqrt(d_k)
    if mask is not None:
        s = jnp.where(jnp.asarray(mask) == 0, -1.0e9, s)
    p = jax.nn.softmax(s, axis=-1)
    x = jnp.einsum("bhqk,bhkd->bhqd", p, value)
    x = x.transpose(0, 2, 1, 3).reshape(B, Sq, d_model)
    return x @ params["w_o"].T + params["b_o"]


if __name__ == "__main__":
    def init_linear(kw, kb, d_out, d_in):
        bound = 1.0 / math.sqrt(d_in)
        w = jax.random.uniform(kw, (d_out, d_in), jnp.float32, -bound, bound)
        b = jax.random.uniform(kb, (d_out,), jnp.float32, -bound, bound)
        return w, b

    def make_params(key, d_model):
        ks = jax.random.split(key, 8)
        w_q, b_q = init_linear(ks[0], ks[1], d_model, d_model)
        w_k, b_k = init_linear(ks[2], ks[3], d_model, d_model)
        w_v, b_v = init_linear(ks[4], ks[5], d_model, d_model)
        w_o, b_o = init_linear(ks[6], ks[7], d_model, d_model)
        return dict(w_q=w_q, b_q=b_q, w_k=w_k, b_k=b_k,
                    w_v=w_v, b_v=b_v, w_o=w_o, b_o=b_o)

    key0 = jax.random.PRNGKey(0)
    kp, kx, kq, kk, kv, kp2, kx2 = jax.random.split(key0, 7)

    # ---- main config: 128-aligned d_model (fast fused-offset path) ----
    B, S, d_model, h = 2, 8, 128, 4
    params = make_params(kp, d_model)
    prep = prepare_params(params, h)

    x_in = jax.random.normal(kx, (B, S, d_model), jnp.float32)
    q_in = jax.random.normal(kq, (B, S, d_model), jnp.float32)
    k_in = jax.random.normal(kk, (B, S, d_model), jnp.float32)
    v_in = jax.random.normal(kv, (B, S, d_model), jnp.float32)

    causal = jnp.tril(jnp.ones((S, S), jnp.int32))
    shared_mask = causal[None, None]                              # (1,1,S,S) batch-shared
    batch_mask = jnp.broadcast_to(causal, (B, 1, S, S)).astype(jnp.int32)

    # 1) Self-attention (fused QKV), shared causal mask, f32.
    out = jax.block_until_ready(
        multi_head_attention_forward(prep, x_in, x_in, x_in, shared_mask))
    ref = reference_forward(params, x_in, x_in, x_in, shared_mask, h)
    assert out.shape == (B, S, d_model)
    assert jnp.allclose(out, ref, atol=5e-3, rtol=5e-3), "self-attn mismatch"

    # 2) Cross-attention with k is v (fused KV projection), per-batch mask.
    out2 = jax.block_until_ready(
        multi_head_attention_forward(prep, q_in, k_in, k_in, batch_mask))
    ref2 = reference_forward(params, q_in, k_in, k_in, batch_mask, h)
    assert jnp.allclose(out2, ref2, atol=5e-3, rtol=5e-3), "fused-KV mismatch"

    # 3) Fully distinct q/k/v, no mask (bias input skipped entirely).
    out3 = jax.block_until_ready(
        multi_head_attention_forward(prep, q_in, k_in, v_in, None))
    ref3 = reference_forward(params, q_in, k_in, v_in, None, h)
    assert jnp.allclose(out3, ref3, atol=5e-3, rtol=5e-3), "no-mask mismatch"

    # 4) bf16 end-to-end activation chain (f32 accumulation / softmax stats).
    prep_bf = prepare_params(params, h, compute_dtype=jnp.bfloat16)
    out_bf = jax.block_until_ready(
        multi_head_attention_forward(prep_bf, x_in, x_in, x_in, shared_mask))
    assert jnp.allclose(out_bf, ref, atol=1e-1, rtol=1e-1), "bf16 mismatch"

    # 5) Non-128-aligned d_model exercises the safe slicing fallback.
    d_model2, h2 = 32, 4
    params2 = make_params(kp2, d_model2)
    prep2 = prepare_params(params2, h2)
    x2 = jax.random.normal(kx2, (B, S, d_model2), jnp.float32)
    out5 = jax.block_until_ready(
        multi_head_attention_forward(prep2, x2, x2, x2, shared_mask))
    ref5 = reference_forward(params2, x2, x2, x2, shared_mask, h2)
    assert jnp.allclose(out5, ref5, atol=5e-3, rtol=5e-3), "unaligned-d_model mismatch"

    print("KERNEL_OK")
</pallas_src>

<mosaic_0001>
module attributes {stable_mosaic.version = 11 : i64} {
  func.func @linear_kernel(%arg0: i32, %arg1: i32, %arg2: i32, %arg3: memref<16x128xf32, #tpu.memory_space<vmem>>, %arg4: memref<384x128xf32, #tpu.memory_space<vmem>>, %arg5: memref<1x384xf32, #tpu.memory_space<vmem>>, %arg6: memref<16x384xf32, #tpu.memory_space<vmem>>, %arg7: memref<16x384xf32, #tpu.memory_space<vmem>>) attributes {dimension_semantics = [#tpu.dimension_semantics<parallel>, #tpu.dimension_semantics<parallel>, #tpu.dimension_semantics<arbitrary>], iteration_bounds = array<i64: 1, 1, 1>, scalar_prefetch = 0 : i64, scratch_operands = 1 : i64, tpu.core_type = #tpu.core_type<tc>, window_params = [{transform_indices = @transform_0, window_bounds = array<i64: 16, 128>}, {transform_indices = @transform_1, window_bounds = array<i64: 384, 128>}, {transform_indices = @transform_2, window_bounds = array<i64: 1, 384>}, {transform_indices = @transform_3, window_bounds = array<i64: 16, 384>}]} {
    %c0_i32 = arith.constant 0 : i32
    %0 = arith.cmpi eq, %arg2, %c0_i32 : i32
    %1 = arith.extui %0 : i1 to i32
    %c0_i32_0 = arith.constant 0 : i32
    %2 = arith.cmpi ne, %1, %c0_i32_0 : i32
    scf.if %2 {
      %cst_10 = arith.constant 0.000000e+00 : f32
      %12 = vector.broadcast %cst_10 : f32 to vector<16x384xf32>
      %c0_11 = arith.constant 0 : index
      %c0_12 = arith.constant 0 : index
      %13 = vector.load %arg7[%c0_11, %c0_12] : memref<16x384xf32, #tpu.memory_space<vmem>>, vector<16x384xf32>
      tpu.vector_store %arg7[%c0_11, %c0_12], %12 {strides = array<i32>} : memref<16x384xf32, #tpu.memory_space<vmem>>, vector<16x384xf32>,
    } else {
    }
    %c0 = arith.constant 0 : index
    %c0_1 = arith.constant 0 : index
    %3 = vector.load %arg7[%c0, %c0_1] : memref<16x384xf32, #tpu.memory_space<vmem>>, vector<16x384xf32>
    %c0_2 = arith.constant 0 : index
    %c0_3 = arith.constant 0 : index
    %4 = vector.load %arg3[%c0_2, %c0_3] : memref<16x128xf32, #tpu.memory_space<vmem>>, vector<16x128xf32>
    %c0_4 = arith.constant 0 : index
    %c0_5 = arith.constant 0 : index
    %5 = vector.load %arg4[%c0_4, %c0_5] : memref<384x128xf32, #tpu.memory_space<vmem>>, vector<384x128xf32>
    %cst = arith.constant dense<0.000000e+00> : vector<16x384xf32>
    %6 = tpu.matmul %4, %5, %cst {dimension_numbers = #tpu.dot_dimension_numbers<[1], [1], [0], [0], [0, 0, 1, 0], [], []>} : vector<16x128xf32>, vector<384x128xf32>, vector<16x384xf32> -> vector<16x384xf32>
    %7 = arith.addf %3, %6 : vector<16x384xf32>
    %c0_6 = arith.constant 0 : index
    %c0_7 = arith.constant 0 : index
    %8 = vector.load %arg7[%c0_6, %c0_7] : memref<16x384xf32, #tpu.memory_space<vmem>>, vector<16x384xf32>
    tpu.vector_store %arg7[%c0_6, %c0_7], %7 {strides = array<i32>} : memref<16x384xf32, #tpu.memory_space<vmem>>, vector<16x384xf32>,
    %c0_i32_8 = arith.constant 0 : i32
    %9 = arith.cmpi eq, %arg2, %c0_i32_8 : i32
    %10 = arith.extui %9 : i1 to i32
    %c0_i32_9 = arith.constant 0 : i32
    %11 = arith.cmpi ne, %10, %c0_i32_9 : i32
    scf.if %11 {
      %c0_10 = arith.constant 0 : index
      %c0_11 = arith.constant 0 : index
      %12 = vector.load %arg7[%c0_10, %c0_11] : memref<16x384xf32, #tpu.memory_space<vmem>>, vector<16x384xf32>
      %c0_12 = arith.constant 0 : index
      %c0_13 = arith.constant 0 : index
      %13 = vector.load %arg5[%c0_12, %c0_13] : memref<1x384xf32, #tpu.memory_space<vmem>>, vector<1x384xf32>
      %14 = vector.broadcast %13 : vector<1x384xf32> to vector<16x384xf32>
      %15 = arith.addf %12, %14 : vector<16x384xf32>
      %c0_14 = arith.constant 0 : index
      %c0_15 = arith.constant 0 : index
      %16 = vector.load %arg6[%c0_14, %c0_15] : memref<16x384xf32, #tpu.memory_space<vmem>>, vector<16x384xf32>
      tpu.vector_store %arg6[%c0_14, %c0_15], %15 {strides = array<i32>} : memref<16x384xf32, #tpu.memory_space<vmem>>, vector<16x384xf32>,
    } else {
    }
    return
  }
  func.func @transform_0(%arg0: i32, %arg1: i32, %arg2: i32) -> (i32, i32) {
    %c0_i32 = arith.constant 0 : i32
    return %arg0, %arg2 : i32, i32
  }
  func.func @transform_1(%arg0: i32, %arg1: i32, %arg2: i32) -> (i32, i32) {
    %c0_i32 = arith.constant 0 : i32
    return %arg1, %arg2 : i32, i32
  }
  func.func @transform_2(%arg0: i32, %arg1: i32, %arg2: i32) -> (i32, i32) {
    %c0_i32 = arith.constant 0 : i32
    %c0_i32_0 = arith.constant 0 : i32
    return %c0_i32, %arg1 : i32, i32
  }
  func.func @transform_3(%arg0: i32, %arg1: i32, %arg2: i32) -> (i32, i32) {
    %c0_i32 = arith.constant 0 : i32
    return %arg0, %arg1 : i32, i32
  }
}

</mosaic_0001>

<bundles_post_ra>
// kernel: tpu_custom_call.1
= control target key start
LH: loop header
LB: loop body
LE: loop exit
PB: predicated region body
PF: predicated region fallthrough
CT: control target
= control target key end

     0   :  { %8 = vsyncpa [#allocation4], 0  ;;  %s632_s0 = inlined_call_operand.hbm [shape: f32[16,128], index: 0, kind: input, shape index: {}]   ;;  %s633_s1 = inlined_call_operand.hbm [shape: f32[384,128], index: 1, kind: input, shape index: {}]   ;;  %s634_s2 = inlined_call_operand.vmem [shape: f32[1,384], index: 2, kind: input, shape index: {}]   ;;  %s635_s3 = inlined_call_operand.hbm [shape: f32[16,384], index: 3, kind: output, shape index: {}]  }
   0x1   :  { %9 = vsyncpa [#allocation7], 0 }
   0x2   :  { %10 = vsyncpa [#allocation5], 0  ;;  %s561_s12 = smov [#allocation3]   ;;  %s489_s16 = scalar_lea.hbm %s632_s0, 256 }
   0x3   :  { %s16_s13 = sshll.u32 %s561_s12, 4  ;;  %p490_p0 = scmp.ne.s32.totalorder %s632_s0, %s489_s16  ;;  %s17_s13 = int_to_ptr.vmem [resolvable:$true] %s16_s13 }
   0x4   :  { %p493_p1 = scmp.lt.u32.totalorder %s489_s16, %s632_s0 }
   0x6   :  { %p495_p2 = pnand %p493_p1, %p490_p0 }
   0x8   :  { %498 = shalt.err (!%p495_p2)
}
   0x9   :  { %s499_s21 = scalar_lea.vmem %s17_s13, 256  ;;  %p504_p4 = scmp.lt.s32.totalorder %s17_s13, %s17_s13 }
   0xa   :  { %p500_p3 = scmp.ne.s32.totalorder %s17_s13, %s499_s21  ;;  %p505_p5 = scmp.lt.s32.totalorder %s499_s21, %s499_s21 }
   0xc   :  { %p506_p6 = por %p505_p5, %p504_p4 }
   0xe   :  { %p507_p7 = pnand %p506_p6, %p500_p3 }
  0x10   :  { %510 = shalt.err (!%p507_p7)
}
  0x11   :  { %s562_s22 = smov 128   ;;  %s563_s23 = smov 8  }
  0x12   :  { %22 = dma.hbm_to_vmem [thread:$0]  %s632_s0, 256, %s17_s13, [#allocation4], %s562_s22, %s562_s22, %s563_s23  }
  0x13   :  { %s564_s26 = smov [#allocation6]   ;;  %s511_s30 = scalar_lea.hbm %s633_s1, 6144 }
  0x14   :  { %s28_s27 = sshll.u32 %s564_s26, 4  ;;  %p512_p8 = scmp.ne.s32.totalorder %s633_s1, %s511_s30  ;;  %s29_s27 = int_to_ptr.vmem [resolvable:$true] %s28_s27 }
  0x15   :  { %p515_p9 = scmp.lt.u32.totalorder %s511_s30, %s633_s1 }
  0x17   :  { %p517_p10 = pnand %p515_p9, %p512_p8 }
  0x19   :  { %520 = shalt.err (!%p517_p10)
}
  0x1a   :  { %s521_s8 = scalar_lea.vmem %s29_s27, 6144  ;;  %p526_p12 = scmp.lt.s32.totalorder %s29_s27, %s29_s27 }
  0x1b   :  { %p522_p11 = scmp.ne.s32.totalorder %s29_s27, %s521_s8  ;;  %p527_p13 = scmp.lt.s32.totalorder %s521_s8, %s521_s8 }
  0x1d   :  { %p528_p0 = por %p527_p13, %p526_p12 }
  0x1f   :  { %p529_p1 = pnand %p528_p0, %p522_p11 }
  0x21   :  { %532 = shalt.err (!%p529_p1)
}
  0x22   :  { %34 = dma.hbm_to_vmem [thread:$0]  %s633_s1, 6144, %s29_s27, [#allocation7], %s562_s22, %s562_s22, %s563_s23  }
  0x23   :  { %555 = dma.done.wait [#allocation4], 256  }
  0x24   :  { %556 = vsyncadd [#allocation4], 4294967040 }
  0x25   :  { %557 = dma.done.wait [#allocation7], 6144  }
  0x26   :  { %558 = vsyncadd [#allocation7], 4294961152  ;;  %v77_v0 = vld [vmem:[#allocation6 + $0x80] sm:$0xff]  ;;  %v78_v1 = vld [vmem:[#allocation6 + $0x88] sm:$0xff]  ;;  %s565_s11 = smov [#allocation8]  }
  0x27   :  { %v61_v2 = vld [vmem:[#allocation6] sm:$0xff]  ;;  %v418_v3 = vpack.c.bf16 %v78_v1, %v77_v0  ;;  %v62_v4 = vld [vmem:[#allocation6 + $0x8] sm:$0xff]  ;;  %v79_v9 = vld [vmem:[#allocation6 + $0x90] sm:$0xff]  ;;  %s316_s12 = sshll.u32 %s565_s11, 4  ;;  %s317_s12 = int_to_ptr.vmem [resolvable:$true] %s316_s12 }
  0x28   :  { %v93_v5 = vld [vmem:[#allocation6 + $0x100] sm:$0xff]  ;;  %v94_v6 = vld [vmem:[#allocation6 + $0x108] sm:$0xff]  ;;  %v420_v7 = vpack.c.bf16 %v62_v4, %v61_v2  ;;  %v80_v10 = vld [vmem:[#allocation6 + $0x98] sm:$0xff]  ;;  %p538_p3 = scmp.lt.s32.totalorder %s317_s12, %s317_s12 }
  0x29   :  { %v450_v8 = vpack.c.bf16 %v94_v6, %v93_v5  ;;  %419 = vmatprep.subr.bf16.mxu0 %v418_v3  ;;  %v422_v11 = vpack.c.bf16 %v80_v10, %v79_v9  ;;  %v95_v12 = vld [vmem:[#allocation6 + $0x110] sm:$0xff]  ;;  %v96_v13 = vld [vmem:[#allocation6 + $0x118] sm:$0xff]  ;;  %v81_v17 = vld [vmem:[#allocation6 + $0xa0] sm:$0xff]  ;;  %v284_v10 = vlaneseq }
  0x2a   :  { %421 = vmatpush3.bf16.xpose.msra.mxu0 %v420_v7  ;;  %v454_v14 = vpack.c.bf16 %v96_v13, %v95_v12  ;;  %v63_v15 = vld [vmem:[#allocation6 + $0x10] sm:$0xff]  ;;  %v64_v16 = vld [vmem:[#allocation6 + $0x18] sm:$0xff]  ;;  %v82_v18 = vld [vmem:[#allocation6 + $0xa8] sm:$0xff] }
  0x2b   :  { %451 = vmatprep.subr.bf16.mxu1 %v450_v8  ;;  %423 = vmatprep.subr.bf16.mxu0 %v422_v11  ;;  %v97_v19 = vld [vmem:[#allocation6 + $0x120] sm:$0xff]  ;;  %v98_v20 = vld [vmem:[#allocation6 + $0x128] sm:$0xff]  ;;  %v424_v21 = vpack.c.bf16 %v64_v16, %v63_v15  ;;  %v426_v22 = vpack.c.bf16 %v82_v18, %v81_v17  ;;  %v83_v26 = vld [vmem:[#allocation6 + $0xb0] sm:$0xff]  ;;  %v285_v11 = vshrl.u32 %v284_v10, 7 }
  0x2c   :  { %453 = vmatpush3.bf16.xpose.msra.mxu1 %v450_v8  ;;  %v458_v23 = vpack.c.bf16 %v98_v20, %v97_v19  ;;  %v65_v24 = vld [vmem:[#allocation6 + $0x20] sm:$0xff]  ;;  %v66_v25 = vld [vmem:[#allocation6 + $0x28] sm:$0xff]  ;;  %v84_v27 = vld [vmem:[#allocation6 + $0xb8] sm:$0xff] }
  0x2d   :  { %455 = vmatprep.subr.bf16.mxu1 %v454_v14  ;;  %v99_v28 = vld [vmem:[#allocation6 + $0x130] sm:$0xff]  ;;  %v100_v29 = vld [vmem:[#allocation6 + $0x138] sm:$0xff]  ;;  %v428_v30 = vpack.c.bf16 %v66_v25, %v65_v24  ;;  %v430_v32 = vpack.c.bf16 %v84_v27, %v83_v26  ;;  %v85_v36 = vld [vmem:[#allocation6 + $0xc0] sm:$0xff]  ;;  %v286_v12 = vsub.s32 0, %v285_v11  ;;  %v294_v15 = vsub.s32 2, %v285_v11 }
  0x2e   :  { %v612_v31 = vld [vmem:[#allocation3] sm:$0xff]  ;;  %v462_v33 = vpack.c.bf16 %v100_v29, %v99_v28  ;;  %v68_v35 = vld [vmem:[#allocation6 + $0x38] sm:$0xff]  ;;  %v86_v37 = vld [vmem:[#allocation6 + $0xc8] sm:$0xff] }
  0x2f   :  { %361 = vmatprep.mubr.f32.mxu0 %v612_v31  ;;  %415 = vmatprep.mubr.f32.mxu1 %v612_v31  ;;  %v67_v34 = vld [vmem:[#allocation6 + $0x30] sm:$0xff]  ;;  %v101_v38 = vld [vmem:[#allocation6 + $0x140] sm:$0xff]  ;;  %v102_v39 = vld [vmem:[#allocation6 + $0x148] sm:$0xff]  ;;  %v434_v41 = vpack.c.bf16 %v86_v37, %v85_v36 }
  0x30   :  { %v432_v40 = vpack.c.bf16 %v68_v35, %v67_v34  ;;  %v466_v42 = vpack.c.bf16 %v102_v39, %v101_v38  ;;  %v69_v43 = vld [vmem:[#allocation6 + $0x40] sm:$0xff]  ;;  %v70_v44 = vld [vmem:[#allocation6 + $0x48] sm:$0xff]  ;;  %v87_v45 = vld [vmem:[#allocation6 + $0xd0] sm:$0xff] }
  0x31   :  { %v88_v46 = vld [vmem:[#allocation6 + $0xd8] sm:$0xff]  ;;  %v103_v47 = vld [vmem:[#allocation6 + $0x150] sm:$0xff]  ;;  %v436_v49 = vpack.c.bf16 %v70_v44, %v69_v43  ;;  %v89_v54 = vld [vmem:[#allocation6 + $0xe0] sm:$0xff] }
  0x32   :  { %425 = vmatpush3.bf16.xpose.msra.mxu0 %v424_v21  ;;  %v104_v48 = vld [vmem:[#allocation6 + $0x158] sm:$0xff]  ;;  %v438_v50 = vpack.c.bf16 %v88_v46, %v87_v45  ;;  %v71_v52 = vld [vmem:[#allocation6 + $0x50] sm:$0xff]  ;;  %v90_v55 = vld [vmem:[#allocation6 + $0xe8] sm:$0xff] }
  0x33   :  { %427 = vmatprep.subr.bf16.mxu0 %v426_v22  ;;  %v470_v51 = vpack.c.bf16 %v104_v48, %v103_v47  ;;  %v72_v53 = vld [vmem:[#allocation6 + $0x58] sm:$0xff]  ;;  %v105_v56 = vld [vmem:[#allocation6 + $0x160] sm:$0xff]  ;;  %v106_v57 = vld [vmem:[#allocation6 + $0x168] sm:$0xff]  ;;  %v442_v59 = vpack.c.bf16 %v90_v55, %v89_v54 }
  0x34   :  { %457 = vmatpush3.bf16.xpose.msra.mxu1 %v454_v14  ;;  %v440_v58 = vpack.c.bf16 %v72_v53, %v71_v52  ;;  %v474_v60 = vpack.c.bf16 %v106_v57, %v105_v56  ;;  %v73_v61 = vld [vmem:[#allocation6 + $0x60] sm:$0xff]  ;;  %v74_v62 = vld [vmem:[#allocation6 + $0x68] sm:$0xff]  ;;  %v91_v63 = vld [vmem:[#allocation6 + $0xf0] sm:$0xff]  ;;  %v290_v14 = vsub.s32 1, %v285_v11 }
  0x35   :  { %459 = vmatprep.subr.bf16.mxu1 %v458_v23  ;;  %v92_v0 = vld [vmem:[#allocation6 + $0xf8] sm:$0xff]  ;;  %v107_v1 = vld [vmem:[#allocation6 + $0x170] sm:$0xff]  ;;  %v444_v3 = vpack.c.bf16 %v74_v62, %v73_v61 }
  0x36   :  { %v108_v2 = vld [vmem:[#allocation6 + $0x178] sm:$0xff]  ;;  %v446_v4 = vpack.c.bf16 %v92_v0, %v91_v63  ;;  %v75_v6 = vld [vmem:[#allocation6 + $0x70] sm:$0xff] }
  0x37   :  { %v478_v5 = vpack.c.bf16 %v108_v2, %v107_v1  ;;  %v76_v7 = vld [vmem:[#allocation6 + $0x78] sm:$0xff]  ;;  %v282_v13 = vld [vmem:[%s634_s2] sm:$0x7]  ;;  %s533_s2 = scalar_lea.vmem %s317_s12, 768 }
  0x38   :  { %v448_v8 = vpack.c.bf16 %v76_v7, %v75_v6  ;;  %v60_v9 = vld [vmem:[#allocation3 + $0x8] sm:$0xff]  ;;  %v287_v16 = vrot.slane %v282_v13, %v286_v12  ;;  %v291_v17 = vrot.slane %v282_v13, %v290_v14  ;;  %v295_v18 = vrot.slane %v282_v13, %v294_v15  ;;  %p534_p2 = scmp.ne.s32.totalorder %s317_s12, %s533_s2  ;;  %p539_p4 = scmp.lt.s32.totalorder %s533_s2, %s533_s2 }
  0x3a   :  { %429 = vmatpush3.bf16.xpose.msra.mxu0 %v428_v30  ;;  %p540_p5 = por %p539_p4, %p538_p3 }
  0x3b   :  { %431 = vmatprep.subr.bf16.mxu0 %v430_v32 }
  0x3c   :  { %461 = vmatpush3.bf16.xpose.msra.mxu1 %v458_v23  ;;  %p541_p6 = pnand %p540_p5, %p534_p2 }
  0x3d   :  { %463 = vmatprep.subr.bf16.mxu1 %v462_v33 }
  0x42   :  { %433 = vmatpush3.bf16.xpose.msra.mxu0 %v432_v40 }
  0x43   :  { %435 = vmatprep.subr.bf16.mxu0 %v434_v41 }
  0x44   :  { %465 = vmatpush3.bf16.xpose.msra.mxu1 %v462_v33 }
  0x45   :  { %467 = vmatprep.subr.bf16.mxu1 %v466_v42 }
  0x4a   :  { %437 = vmatpush3.bf16.xpose.msra.mxu0 %v436_v49 }
  0x4b   :  { %439 = vmatprep.subr.bf16.mxu0 %v438_v50 }
  0x4c   :  { %469 = vmatpush3.bf16.xpose.msra.mxu1 %v466_v42 }
  0x4d   :  { %471 = vmatprep.subr.bf16.mxu1 %v470_v51 }
  0x52   :  { %441 = vmatpush3.bf16.xpose.msra.mxu0 %v440_v58 }
  0x53   :  { %443 = vmatprep.subr.bf16.mxu0 %v442_v59 }
  0x54   :  { %473 = vmatpush3.bf16.xpose.msra.mxu1 %v470_v51 }
  0x55   :  { %475 = vmatprep.subr.bf16.mxu1 %v474_v60 }
  0x5a   :  { %445 = vmatpush3.bf16.xpose.msra.mxu0 %v444_v3 }
  0x5b   :  { %447 = vmatprep.subr.bf16.mxu0 %v446_v4 }
  0x5c   :  { %477 = vmatpush3.bf16.xpose.msra.mxu1 %v474_v60 }
  0x5d   :  { %479 = vmatprep.subr.bf16.mxu1 %v478_v5 }
  0x62   :  { %449 = vmatpush3.bf16.xpose.msra.mxu0 %v448_v8 }
  0x64   :  { %481 = vmatpush3.bf16.xpose.msra.mxu1 %v478_v5 }
  0x69   :  { %362 = vmatmul.mubr.f32.vlgmr.msra.gmra.mrb[0].mxu0 %v612_v31 }
  0x6a   :  { %363 = vmatprep.mubr.f32.mxu0 %v60_v9 }
  0x6b   :  { %416 = vmatmul.mubr.f32.vlgmr.msra.gmra.mrb[0].mxu1 %v60_v9 }
  0x6d   :  { %364 = vmatmul.mubr.f32.gmra.mrb[2].mxu0 %v60_v9 }
 0x13c   :  { %v175_v19 = vpop.f32.mrb[0].mxu0 }
 0x13d   :  { %v299_v20 = vadd.f32 %v287_v16, %v175_v19  ;;  %v177_v21 = vpop.f32.mrb[1].mxu0 }
 0x13e   :  { %v417_v22 = vpop.f32.mrb[0].mxu1  ;;  %v300_v23 = vadd.f32 %v291_v17, %v177_v21 }
 0x13f   :  { %v304_v24 = vadd.f32 %v417_v22, %v295_v18  ;;  %v252_v25 = vpop.f32.mrb[1].mxu1  ;;  %305 = vst [vmem:[#allocation8] sm:$0xff] %v299_v20 }
 0x140   :  { %v301_v26 = vadd.f32 %v295_v18, %v252_v25  ;;  %306 = vst [vmem:[#allocation8 + $0x8] sm:$0xff] %v300_v23  ;;  %v181_v27 = vpop.f32.mrb[2].mxu0 }
 0x141   :  { %310 = vst [vmem:[#allocation8 + $0x28] sm:$0xff] %v304_v24  ;;  %v302_v28 = vadd.f32 %v287_v16, %v181_v27  ;;  %v183_v29 = vpop.f32.mrb[3].mxu0 }
 0x142   :  { %307 = vst [vmem:[#allocation8 + $0x10] sm:$0xff] %v301_v26  ;;  %v303_v30 = vadd.f32 %v291_v17, %v183_v29 }
 0x143   :  { %308 = vst [vmem:[#allocation8 + $0x18] sm:$0xff] %v302_v28 }
 0x144   :  { %309 = vst [vmem:[#allocation8 + $0x20] sm:$0xff] %v303_v30 }
 0x145   :  { %544 = shalt.err (!%p541_p6)
}
 0x146   :  { %s545_s15 = scalar_lea.hbm %s635_s3, 768 }
 0x147   :  { %p546_p7 = scmp.ne.s32.totalorder %s635_s3, %s545_s15  ;;  %p549_p8 = scmp.lt.u32.totalorder %s545_s15, %s635_s3 }
 0x149   :  { %p551_p9 = pnand %p549_p8, %p546_p7 }
 0x14b   :  { %554 = shalt.err (!%p551_p9)
}
 0x14c   :  { %s566_s20 = smov 384   ;;  %s567_s21 = smov 24  }
 0x14d   :  { %322 = dma.vmem_to_hbm [thread:$0]  %s317_s12, 768, %s635_s3, [#allocation5], %s566_s20, %s566_s20, %s567_s21  }
 0x14e   :  { %559 = dma.done.wait [#allocation5], 768  }
 0x14f   :  { %560 = vsyncadd [#allocation5], 4294966528 }
 0x150   :  { %326 = vsyncpa [#allocation4], 1 }
 0x151   :  { %327 = vsyncpa [#allocation7], 1 }
 0x152   :  { %328 = vsyncpa [#allocation5], 1 }

</bundles_post_ra>
